<compile_context>
chip_gen: v6e
topology: v6e:2x2x1
jax: 0.10.0
libtpu: 0.0.40
codegen_flags: <defaults>
</compile_context>

<pallas_src>
import functools

import jax
import jax.numpy as jnp
from jax.experimental import pallas as pl
from jax.experimental.pallas import tpu as pltpu


def _round_up(x: int, m: int) -> int:
    return ((x + m - 1) // m) * m


def _choose_tm(batch: int) -> int:
    """Batch-tile rows: >=256 when the batch is big enough, else pad to 8."""
    if batch >= 512:
        return 512
    if batch >= 256:
        return 256
    return max(8, _round_up(batch, 8))


def _make_policy_kernel(n_trunk_layers: int, action_dim: int):
    """Fused kernel: n_trunk trunk layers + one fused (mean|log_std) head."""

    def kernel(*refs):
        # refs = [x, (w,b)*n_trunk, w_heads, b_heads, out]
        x_ref = refs[0]
        out_ref = refs[-1]
        p = refs[1:-1]

        x = x_ref[...]  # already f32

        # MLP trunk: ReLU on all layers except the last (output_activation=Identity).
        for i in range(n_trunk_layers):
            w = p[2 * i][...]
            b = p[2 * i + 1][...]
            x = jnp.dot(x, w, preferred_element_type=jnp.float32) + b
            if i < n_trunk_layers - 1:
                x = jnp.maximum(x, 0.0)

        # Fused heads: one (TM, 2*action_dim) matmul instead of two K=hidden,
        # N=action_dim pushes; tanh only on the log_std half via lane select.
        w_h = p[2 * n_trunk_layers][...]
        b_h = p[2 * n_trunk_layers + 1][...]
        heads = jnp.dot(x, w_h, preferred_element_type=jnp.float32) + b_h
        lane = jax.lax.broadcasted_iota(jnp.int32, heads.shape, dimension=1)
        fused = jnp.where(lane < action_dim, heads, jnp.tanh(heads))
        out_ref[...] = fused.astype(out_ref.dtype)

    return kernel


@functools.partial(jax.jit, static_argnames=("n_trunk",))
def gaussian_mlp_policy_forward(state, params, n_trunk):
    """params: flat tuple (w1, b1, ..., wN, bN, w_mean, b_mean, w_logstd, b_logstd)."""
    B, state_dim = state.shape
    w_m, b_m, w_s, b_s = params[2 * n_trunk:2 * n_trunk + 4]
    action_dim = w_m.shape[1]
    hidden_last = w_m.shape[0]

    # Fuse the two heads into a single lane-denser weight/bias.
    w_heads = jnp.concatenate([w_m, w_s], axis=1)        # (hidden_last, 2*A)
    b_heads = jnp.concatenate([b_m, b_s], axis=1)        # (1, 2*A)
    trunk_params = params[:2 * n_trunk]
    kernel_params = tuple(trunk_params) + (w_heads, b_heads)

    # Batch tiling.
    tm = _choose_tm(B)
    b_pad = _round_up(B, tm)
    if b_pad != B:
        state = jnp.pad(state, ((0, b_pad - B), (0, 0)))
    grid = (b_pad // tm,)

    # BlockSpecs: state/output tiled over batch; weights resident (constant
    # block index -> Pallas skips re-DMA between grid steps).
    in_specs = [pl.BlockSpec((tm, state_dim), lambda i: (i, 0))]
    for prm in kernel_params:
        in_specs.append(pl.BlockSpec(prm.shape, lambda i: (0, 0)))
    out_spec = pl.BlockSpec((tm, 2 * action_dim), lambda i: (i, 0))

    # Cost estimate (advisory).
    flops = 0
    for i in range(n_trunk):
        wi = trunk_params[2 * i]
        flops += 2 * b_pad * wi.shape[0] * wi.shape[1]
    flops += 2 * b_pad * hidden_last * 2 * action_dim
    param_bytes = sum(int(p.size) * p.dtype.itemsize for p in kernel_params)
    bytes_accessed = (b_pad * state_dim * 4) + (b_pad * 2 * action_dim * 4) + param_bytes
    cost = pl.CostEstimate(
        flops=flops,
        transcendentals=b_pad * 2 * action_dim,
        bytes_accessed=bytes_accessed,
    )

    kernel = _make_policy_kernel(n_trunk, action_dim)

    fused_out = pl.pallas_call(
        kernel,
        out_shape=jax.ShapeDtypeStruct((b_pad, 2 * action_dim), jnp.float32),
        grid=grid,
        in_specs=in_specs,
        out_specs=out_spec,
        compiler_params=pltpu.CompilerParams(
            dimension_semantics=("parallel",)),
        cost_estimate=cost,
    )(state, *kernel_params)

    mean = fused_out[:B, :action_dim]
    log_std = fused_out[:B, action_dim:]
    return mean, log_std


def init_params(key, state_dim, hidden_dims, action_dim):
    """Deterministic orthogonal init (gain = tanh gain = 5/3), zero biases."""
    gain = 5.0 / 3.0
    ortho = jax.nn.initializers.orthogonal(scale=gain)
    params = []
    in_dim = state_dim
    for out_dim in list(hidden_dims):
        key, sub = jax.random.split(key)
        w = ortho(sub, (in_dim, out_dim), jnp.float32)
        b = jnp.zeros((1, out_dim), jnp.float32)
        params += [w, b]
        in_dim = out_dim
    # mean head
    key, sub = jax.random.split(key)
    w_m = ortho(sub, (in_dim, action_dim), jnp.float32)
    b_m = jnp.zeros((1, action_dim), jnp.float32)
    # log_std head
    key, sub = jax.random.split(key)
    w_s = ortho(sub, (in_dim, action_dim), jnp.float32)
    b_s = jnp.zeros((1, action_dim), jnp.float32)
    params += [w_m, b_m, w_s, b_s]
    return tuple(params)


def reference_forward(state, params, n_trunk):
    """Plain-JAX reference for correctness check."""
    x = state
    for i in range(n_trunk):
        w, b = params[2 * i], params[2 * i + 1]
        x = x @ w + b
        if i < n_trunk - 1:
            x = jnp.maximum(x, 0.0)
    w_m, b_m, w_s, b_s = params[2 * n_trunk:2 * n_trunk + 4]
    mean = x @ w_m + b_m
    log_std = jnp.tanh(x @ w_s + b_s)
    return mean, log_std


if __name__ == "__main__":
    key = jax.random.PRNGKey(0)

    batch = 8
    state_dim = 16
    hidden_dims = [32, 32]
    action_dim = 4
    n_trunk = len(hidden_dims)

    key, pkey, skey = jax.random.split(key, 3)
    params = init_params(pkey, state_dim, hidden_dims, action_dim)
    state = jax.random.normal(skey, (batch, state_dim), jnp.float32)

    mean, log_std = gaussian_mlp_policy_forward(state, params, n_trunk)
    mean = jax.block_until_ready(mean)
    log_std = jax.block_until_ready(log_std)

    mean_ref, log_std_ref = reference_forward(state, params, n_trunk)
    assert mean.shape == (batch, action_dim)
    assert log_std.shape == (batch, action_dim)
    assert jnp.allclose(mean, mean_ref, atol=1e-5, rtol=1e-5)
    assert jnp.allclose(log_std, log_std_ref, atol=1e-5, rtol=1e-5)

    # Also exercise a batch that forces padding + multiple grid steps.
    key, skey2 = jax.random.split(key)
    big_state = jax.random.normal(skey2, (300, state_dim), jnp.float32)
    mean_b, log_std_b = gaussian_mlp_policy_forward(big_state, params, n_trunk)
    mean_b = jax.block_until_ready(mean_b)
    mean_b_ref, log_std_b_ref = reference_forward(big_state, params, n_trunk)
    assert jnp.allclose(mean_b, mean_b_ref, atol=1e-5, rtol=1e-5)
    assert jnp.allclose(log_std_b, log_std_b_ref, atol=1e-5, rtol=1e-5)

    print("KERNEL_OK")
</pallas_src>

<mosaic_0001>
module attributes {stable_mosaic.version = 11 : i64} {
  func.func @kernel(%arg0: i32, %arg1: memref<8x16xf32, #tpu.memory_space<vmem>>, %arg2: memref<16x32xf32, #tpu.memory_space<vmem>>, %arg3: memref<1x32xf32, #tpu.memory_space<vmem>>, %arg4: memref<32x32xf32, #tpu.memory_space<vmem>>, %arg5: memref<1x32xf32, #tpu.memory_space<vmem>>, %arg6: memref<32x8xf32, #tpu.memory_space<vmem>>, %arg7: memref<1x8xf32, #tpu.memory_space<vmem>>, %arg8: memref<8x8xf32, #tpu.memory_space<vmem>>) attributes {dimension_semantics = [#tpu.dimension_semantics<parallel>], iteration_bounds = array<i64: 1>, scalar_prefetch = 0 : i64, scratch_operands = 0 : i64, tpu.core_type = #tpu.core_type<tc>, window_params = [{transform_indices = @transform_0, window_bounds = array<i64: 8, 16>}, {pipeline_mode = #tpu.pipeline_mode<synchronous>, transform_indices = @transform_1, window_bounds = array<i64: 16, 32>}, {pipeline_mode = #tpu.pipeline_mode<synchronous>, transform_indices = @transform_2, window_bounds = array<i64: 1, 32>}, {pipeline_mode = #tpu.pipeline_mode<synchronous>, transform_indices = @transform_3, window_bounds = array<i64: 32, 32>}, {pipeline_mode = #tpu.pipeline_mode<synchronous>, transform_indices = @transform_4, window_bounds = array<i64: 1, 32>}, {pipeline_mode = #tpu.pipeline_mode<synchronous>, transform_indices = @transform_5, window_bounds = array<i64: 32, 8>}, {pipeline_mode = #tpu.pipeline_mode<synchronous>, transform_indices = @transform_6, window_bounds = array<i64: 1, 8>}, {transform_indices = @transform_7, window_bounds = array<i64: 8, 8>}]} {
    %c0 = arith.constant 0 : index
    %c0_0 = arith.constant 0 : index
    %0 = vector.load %arg1[%c0, %c0_0] : memref<8x16xf32, #tpu.memory_space<vmem>>, vector<8x16xf32>
    %c0_1 = arith.constant 0 : index
    %c0_2 = arith.constant 0 : index
    %1 = vector.load %arg2[%c0_1, %c0_2] : memref<16x32xf32, #tpu.memory_space<vmem>>, vector<16x32xf32>
    %c0_3 = arith.constant 0 : index
    %c0_4 = arith.constant 0 : index
    %2 = vector.load %arg3[%c0_3, %c0_4] : memref<1x32xf32, #tpu.memory_space<vmem>>, vector<1x32xf32>
    %cst = arith.constant dense<0.000000e+00> : vector<8x32xf32>
    %3 = tpu.matmul %0, %1, %cst {dimension_numbers = #tpu.dot_dimension_numbers<[1], [0], [0], [1], [0, 0, 1, 1], [], []>} : vector<8x16xf32>, vector<16x32xf32>, vector<8x32xf32> -> vector<8x32xf32>
    %4 = vector.broadcast %2 : vector<1x32xf32> to vector<8x32xf32>
    %5 = arith.addf %3, %4 : vector<8x32xf32>
    %cst_5 = arith.constant 0.000000e+00 : f32
    %6 = vector.broadcast %cst_5 : f32 to vector<8x32xf32>
    %7 = arith.maximumf %5, %6 : vector<8x32xf32>
    %c0_6 = arith.constant 0 : index
    %c0_7 = arith.constant 0 : index
    %8 = vector.load %arg4[%c0_6, %c0_7] : memref<32x32xf32, #tpu.memory_space<vmem>>, vector<32x32xf32>
    %c0_8 = arith.constant 0 : index
    %c0_9 = arith.constant 0 : index
    %9 = vector.load %arg5[%c0_8, %c0_9] : memref<1x32xf32, #tpu.memory_space<vmem>>, vector<1x32xf32>
    %cst_10 = arith.constant dense<0.000000e+00> : vector<8x32xf32>
    %10 = tpu.matmul %7, %8, %cst_10 {dimension_numbers = #tpu.dot_dimension_numbers<[1], [0], [0], [1], [0, 0, 1, 1], [], []>} : vector<8x32xf32>, vector<32x32xf32>, vector<8x32xf32> -> vector<8x32xf32>
    %11 = vector.broadcast %9 : vector<1x32xf32> to vector<8x32xf32>
    %12 = arith.addf %10, %11 : vector<8x32xf32>
    %c0_11 = arith.constant 0 : index
    %c0_12 = arith.constant 0 : index
    %13 = vector.load %arg6[%c0_11, %c0_12] : memref<32x8xf32, #tpu.memory_space<vmem>>, vector<32x8xf32>
    %c0_13 = arith.constant 0 : index
    %c0_14 = arith.constant 0 : index
    %14 = vector.load %arg7[%c0_13, %c0_14] : memref<1x8xf32, #tpu.memory_space<vmem>>, vector<1x8xf32>
    %cst_15 = arith.constant dense<0.000000e+00> : vector<8x8xf32>
    %15 = tpu.matmul %12, %13, %cst_15 {dimension_numbers = #tpu.dot_dimension_numbers<[1], [0], [0], [1], [0, 0, 1, 1], [], []>} : vector<8x32xf32>, vector<32x8xf32>, vector<8x8xf32> -> vector<8x8xf32>
    %16 = vector.broadcast %14 : vector<1x8xf32> to vector<8x8xf32>
    %17 = arith.addf %15, %16 : vector<8x8xf32>
    %18 = tpu.iota {dimensions = array<i32: 1>} : vector<8x8xi32>
    %c4_i32 = arith.constant 4 : i32
    %19 = vector.broadcast %c4_i32 : i32 to vector<8x8xi32>
    %20 = arith.cmpi slt, %18, %19 : vector<8x8xi32>
    %21 = math.tanh %17 : vector<8x8xf32>
    %22 = arith.select %20, %17, %21 : vector<8x8xi1>, vector<8x8xf32>
    %c0_16 = arith.constant 0 : index
    %c0_17 = arith.constant 0 : index
    %23 = vector.load %arg8[%c0_16, %c0_17] : memref<8x8xf32, #tpu.memory_space<vmem>>, vector<8x8xf32>
    tpu.vector_store %arg8[%c0_16, %c0_17], %22 {strides = array<i32>} : memref<8x8xf32, #tpu.memory_space<vmem>>, vector<8x8xf32>,
    return
  }
  func.func @transform_0(%arg0: i32) -> (i32, i32) {
    %c0_i32 = arith.constant 0 : i32
    %c0_i32_0 = arith.constant 0 : i32
    return %arg0, %c0_i32 : i32, i32
  }
  func.func @transform_1(%arg0: i32) -> (i32, i32) {
    %c0_i32 = arith.constant 0 : i32
    %c0_i32_0 = arith.constant 0 : i32
    %c0_i32_1 = arith.constant 0 : i32
    return %c0_i32, %c0_i32_0 : i32, i32
  }
  func.func @transform_2(%arg0: i32) -> (i32, i32) {
    %c0_i32 = arith.constant 0 : i32
    %c0_i32_0 = arith.constant 0 : i32
    %c0_i32_1 = arith.constant 0 : i32
    return %c0_i32, %c0_i32_0 : i32, i32
  }
  func.func @transform_3(%arg0: i32) -> (i32, i32) {
    %c0_i32 = arith.constant 0 : i32
    %c0_i32_0 = arith.constant 0 : i32
    %c0_i32_1 = arith.constant 0 : i32
    return %c0_i32, %c0_i32_0 : i32, i32
  }
  func.func @transform_4(%arg0: i32) -> (i32, i32) {
    %c0_i32 = arith.constant 0 : i32
    %c0_i32_0 = arith.constant 0 : i32
    %c0_i32_1 = arith.constant 0 : i32
    return %c0_i32, %c0_i32_0 : i32, i32
  }
  func.func @transform_5(%arg0: i32) -> (i32, i32) {
    %c0_i32 = arith.constant 0 : i32
    %c0_i32_0 = arith.constant 0 : i32
    %c0_i32_1 = arith.constant 0 : i32
    return %c0_i32, %c0_i32_0 : i32, i32
  }
  func.func @transform_6(%arg0: i32) -> (i32, i32) {
    %c0_i32 = arith.constant 0 : i32
    %c0_i32_0 = arith.constant 0 : i32
    %c0_i32_1 = arith.constant 0 : i32
    return %c0_i32, %c0_i32_0 : i32, i32
  }
  func.func @transform_7(%arg0: i32) -> (i32, i32) {
    %c0_i32 = arith.constant 0 : i32
    %c0_i32_0 = arith.constant 0 : i32
    return %arg0, %c0_i32 : i32, i32
  }
}

</mosaic_0001>

<bundles_post_ra>
// kernel: gaussian_mlp_policy_forward.1
= control target key start
LH: loop header
LB: loop body
LE: loop exit
PB: predicated region body
PF: predicated region fallthrough
CT: control target
= control target key end

     0   :  { %v343_v0 = vmov 0.0   ;;  %vm344_vm0 = vmmov 0   ;;  %vm36_vm1 = vcmask 130048   ;;  %vm122_vm2 = vcmask 261120   ;;  %s430_s1 = inlined_call_operand.vmem [shape: f32[16,32], index: 1, kind: input, shape index: {}]   ;;  %s431_s0 = inlined_call_operand.vmem [shape: f32[8,16], index: 0, kind: input, shape index: {}]   ;;  %s432_s3 = inlined_call_operand.vmem [shape: f32[32,32], index: 3, kind: input, shape index: {}]   ;;  %s433_s5 = inlined_call_operand.vmem [shape: f32[32,8], index: 5, kind: input, shape index: {}]   ;;  %s434_s2 = inlined_call_operand.vmem [shape: f32[1,32], index: 2, kind: input, shape index: {}]   ;;  %s435_s4 = inlined_call_operand.vmem [shape: f32[1,32], index: 4, kind: input, shape index: {}]   ;;  %s436_s6 = inlined_call_operand.vmem [shape: f32[1,8], index: 6, kind: input, shape index: {}]   ;;  %s437_s7 = inlined_call_operand.vmem [shape: f32[8,8], index: 7, kind: output, shape index: {}]  }
   0x1   :  { %310 = vmatprep.subr.mxu0 %v343_v0  ;;  %v28_v1 = vld [vmem:[%s430_s1 + $0x8] sm:$0xff]  ;;  %v27_v2 = vld [vmem:[%s430_s1] sm:$0xff]  ;;  %314 = vmatprep.mubr.msk.f32.mxu0 %vm344_vm0, %v343_v0  ;;  %v114_v4 = vld [vmem:[%s432_s3 + $0x18] sm:$0xff]  ;;  %v280_v25 = vlaneseq  ;;  %vm285_vm4 = vcmask 64512  }
   0x2   :  { %311 = vmatpush3.msra.mxu0 %v28_v1  ;;  %v26_v3 = vld [vmem:[%s431_s0] sm:$0xff]  ;;  %317 = vmatprep.subr.mxu1 %v343_v0  ;;  %v113_v5 = vld [vmem:[%s432_s3 + $0x10] sm:$0xff]  ;;  %v112_v6 = vld [vmem:[%s432_s3 + $0x8] sm:$0xff] }
   0x3   :  { %312 = vmatprep.subr.mxu0 %v343_v0  ;;  %318 = vmatpush3.msra.mxu1 %v114_v4  ;;  %v111_v7 = vld [vmem:[%s432_s3] sm:$0xff]  ;;  %v199_v8 = vld [vmem:[%s433_s5 + $0x18] sm:$0xff]  ;;  %v198_v9 = vld [vmem:[%s433_s5 + $0x10] sm:$0xff]  ;;  %v281_v26 = vand.u32 127, %v280_v25 }
   0x4   :  { %313 = vmatpush3.msra.mxu0 %v27_v2  ;;  %319 = vmatprep.subr.mxu1 %v343_v0  ;;  %v291_v10 = vld [vmem:[%s434_s2] ss:$0 sm:$0xff]  ;;  %v197_v15 = vld [vmem:[%s433_s5 + $0x8] sm:$0xff] }
   0x5   :  { %315 = vmatmul.mubr.msk.f32.vlgmr.msra.gmra.mxu0 %vm36_vm1, %v26_v3  ;;  %325 = vmatprep.mubr.msk.f32.mxu1 %vm344_vm0, %v343_v0  ;;  %v196_v16 = vld [vmem:[%s433_s5] sm:$0xff]  ;;  %vm282_vm3 = vcmp.lt.s32.totalorder %v281_v26, 4 }
   0x6   :  { %328 = vmatprep.subr.mxu0 %v343_v0  ;;  %336 = vmatprep.mubr.msk.f32.mxu0 %vm344_vm0, %v343_v0  ;;  %v293_v17 = vld [vmem:[%s435_s4] ss:$0 sm:$0xff] }
   0x7   :  { %320 = vmatpush3.msra.mxu1 %v113_v5  ;;  %329 = vmatpush3.msra.mxu0 %v199_v8  ;;  %v295_v21 = vld [vmem:[%s436_s6] ss:$0 sm:$0xff] }
   0x8   :  { %321 = vmatprep.subr.mxu1 %v343_v0  ;;  %330 = vmatprep.subr.mxu0 %v343_v0 }
   0x9   :  { %322 = vmatpush3.msra.mxu1 %v112_v6  ;;  %331 = vmatpush3.msra.mxu0 %v198_v9 }
   0xa   :  { %323 = vmatprep.subr.mxu1 %v343_v0  ;;  %332 = vmatprep.subr.mxu0 %v343_v0 }
   0xb   :  { %324 = vmatpush3.msra.mxu1 %v111_v7  ;;  %333 = vmatpush3.msra.mxu0 %v197_v15 }
   0xc   :  { %334 = vmatprep.subr.mxu0 %v343_v0 }
   0xd   :  { %335 = vmatpush3.msra.mxu0 %v196_v16 }
  0xc5   :  { %v106_v11 = vpop.f32.mrf.mxu0 }
  0xc6   :  { %v107_v12 = vadd.f32 %v291_v10, %v106_v11 }
  0xc7   :  { %v316_v13 = vpop.f32.mrf.mxu0 }
  0xc8   :  { %v110_v14 = vmax.f32 %v107_v12, 0.0 }
  0xca   :  { %326 = vmatmul.mubr.msk.f32.vlgmr.msra.gmra.mxu1 %vm122_vm2, %v110_v14 }
 0x18a   :  { %v192_v18 = vpop.f32.mrf.mxu1 }
 0x18b   :  { %v193_v19 = vadd.f32 %v293_v17, %v192_v18 }
 0x18c   :  { %v327_v20 = vpop.f32.mrf.mxu1 }
 0x18d   :  { %337 = vmatmul.mubr.msk.f32.vlgmr.msra.gmra.mxu0 %vm122_vm2, %v193_v19 }
 0x24d   :  { %v276_v22 = vpop.f32.mrf.mxu0 }
 0x24e   :  { %v277_v23 = vadd.f32 %v295_v21, %v276_v22 }
 0x24f   :  { %v338_v24 = vpop.f32.mrf.mxu0 }
 0x250   :  { %341 = vtanh.f32 %v277_v23 }
 0x25d   :  { %v342_v27 = vpop.eup %341 }
 0x25e   :  { %v284_v28 = vsel %vm282_vm3, %v277_v23, %v342_v27 }
 0x25f   :  { %286 = vst.msk [vmem:[%s437_s7] sm:$0xff] %vm285_vm4, %v284_v28 }

</bundles_post_ra>
